<compile_context>
chip_gen: v7x
topology: tpu7x:2x2x1
jax: 0.10.0
libtpu: 0.0.40
codegen_flags: <defaults>
</compile_context>

<pallas_src>
import functools

import jax
import jax.numpy as jnp
from jax.experimental import pallas as pl
from jax.experimental.pallas import tpu as pltpu


def _round_up(x, m):
    return ((x + m - 1) // m) * m


def _pad2(a, rows, cols):
    r, c = a.shape
    if r == rows and c == cols:
        return a
    return jnp.pad(a, ((0, rows - r), (0, cols - c)))


def _dense_act_dropout_kernel(x_ref, w_ref, b_ref, u_ref, o_ref, acc_ref, *,
                              negative_slope, keep_prob, apply_dropout):
    k = pl.program_id(2)

    @pl.when(k == 0)
    def _():
        acc_ref[...] = jnp.zeros_like(acc_ref)

    # Pure MXU accumulate in the inner (K) loop, f32 accumulation.
    acc_ref[...] += jnp.dot(x_ref[...], w_ref[...],
                            preferred_element_type=jnp.float32)

    @pl.when(k == pl.num_programs(2) - 1)
    def _():
        # Epilogue runs once per output tile (not once per K step).
        z = acc_ref[...] + b_ref[...]
        a = jnp.maximum(z, negative_slope * z)          # LeakyReLU
        if apply_dropout:
            # Inverted dropout with a precomputed per-element uniform.
            a = jnp.where(u_ref[...] < keep_prob, a * (1.0 / keep_prob), 0.0)
        o_ref[...] = a.astype(o_ref.dtype)


def dense_layer_with_act(x, w_t, b, dropout_key, *, negative_slope=0.01,
                         dropout_p=0.1, training=True,
                         tm=None, tn=None, tk=None):
    """x: [B, IN] f32; w_t: [IN, OUT] f32 (pre-transposed Linear weight);
       b: [OUT] f32; dropout_key: jax PRNG key for the dropout mask."""
    B, IN = x.shape
    IN_w, OUT = w_t.shape
    assert IN_w == IN

    # Tile sizes: rows a multiple of 8 (sublane), K/OUT tiles lane-dense
    # (multiples of 128).  Tiles are modest so they fit the v7x 64 MiB VMEM
    # budget with double-buffering headroom.
    tm = tm or min(256, _round_up(B, 8))
    tk = tk or min(512, _round_up(IN, 128))
    tn = tn or min(256, _round_up(OUT, 128))

    Bp = _round_up(B, tm)
    Kp = _round_up(IN, tk)
    Np = _round_up(OUT, tn)

    xp = _pad2(x, Bp, Kp)
    wp = _pad2(w_t, Kp, Np)
    bp = _pad2(b.reshape(1, OUT), 1, Np)

    apply_dropout = bool(training) and float(dropout_p) > 0.0
    keep_prob = 1.0 - float(dropout_p)

    # TODO(synk): dropout mask is drawn host-side with jax.random instead of
    # the on-chip PRNG (pltpu.prng_*), so semantics match torch.nn.Dropout but
    # the exact random stream does not.
    u = jax.random.uniform(dropout_key, (Bp, Np), jnp.float32)

    grid = (Bp // tm, Np // tn, Kp // tk)

    kernel = functools.partial(
        _dense_act_dropout_kernel,
        negative_slope=float(negative_slope),
        keep_prob=keep_prob,
        apply_dropout=apply_dropout,
    )

    out_padded = pl.pallas_call(
        kernel,
        out_shape=jax.ShapeDtypeStruct((Bp, Np), x.dtype),
        grid=grid,
        in_specs=[
            pl.BlockSpec((tm, tk), lambda i, j, k: (i, k)),   # x tile
            pl.BlockSpec((tk, tn), lambda i, j, k: (k, j)),   # W^T tile
            pl.BlockSpec((1, tn), lambda i, j, k: (0, j)),    # bias tile
            pl.BlockSpec((tm, tn), lambda i, j, k: (i, j)),   # dropout uniforms
        ],
        out_specs=pl.BlockSpec((tm, tn), lambda i, j, k: (i, j)),
        scratch_shapes=[pltpu.VMEM((tm, tn), jnp.float32)],
        compiler_params=pltpu.CompilerParams(
            dimension_semantics=("parallel", "parallel", "arbitrary"),
            vmem_limit_bytes=32 * 1024 * 1024,
        ),
    )(xp, wp, bp, u)

    return out_padded[:B, :OUT]


if __name__ == "__main__":
    # cfg equivalent: act_type='lrelu', act_param=0.01, dropout_probs=0.1
    batch = 8
    input_size = 32
    output_size = 16
    act_param = 0.01
    dropout_probs = 0.1

    key = jax.random.PRNGKey(0)
    kx, kw, kb, kd = jax.random.split(key, 4)

    # torch.nn.Linear default init: U(-1/sqrt(in), 1/sqrt(in))
    bound = 1.0 / (input_size ** 0.5)
    w = jax.random.uniform(kw, (output_size, input_size), jnp.float32,
                           minval=-bound, maxval=bound)   # torch layout [OUT, IN]
    b = jax.random.uniform(kb, (output_size,), jnp.float32,
                           minval=-bound, maxval=bound)
    x = jax.random.normal(kx, (batch, input_size), jnp.float32)

    out = dense_layer_with_act(
        x,
        jnp.transpose(w),          # [IN, OUT] for the kernel
        b,
        kd,
        negative_slope=act_param,
        dropout_p=dropout_probs,
        training=True,
    )
    jax.block_until_ready(out)
    assert out.shape == (batch, output_size)
    print("KERNEL_OK")
</pallas_src>

<mosaic_0001>
module attributes {stable_mosaic.version = 11 : i64} {
  func.func @_dense_act_dropout_kernel(%arg0: i32, %arg1: i32, %arg2: i32, %arg3: memref<8x128xf32, #tpu.memory_space<vmem>>, %arg4: memref<128x128xf32, #tpu.memory_space<vmem>>, %arg5: memref<1x128xf32, #tpu.memory_space<vmem>>, %arg6: memref<8x128xf32, #tpu.memory_space<vmem>>, %arg7: memref<8x128xf32, #tpu.memory_space<vmem>>, %arg8: memref<8x128xf32, #tpu.memory_space<vmem>>) attributes {dimension_semantics = [#tpu.dimension_semantics<parallel>, #tpu.dimension_semantics<parallel>, #tpu.dimension_semantics<arbitrary>], iteration_bounds = array<i64: 1, 1, 1>, scalar_prefetch = 0 : i64, scratch_operands = 1 : i64, tpu.core_type = #tpu.core_type<tc>, window_params = [{transform_indices = @transform_0, window_bounds = array<i64: 8, 128>}, {transform_indices = @transform_1, window_bounds = array<i64: 128, 128>}, {transform_indices = @transform_2, window_bounds = array<i64: 1, 128>}, {transform_indices = @transform_3, window_bounds = array<i64: 8, 128>}, {transform_indices = @transform_4, window_bounds = array<i64: 8, 128>}]} {
    %c0_i32 = arith.constant 0 : i32
    %0 = arith.cmpi eq, %arg2, %c0_i32 : i32
    %1 = arith.extui %0 : i1 to i32
    %c0_i32_0 = arith.constant 0 : i32
    %2 = arith.cmpi ne, %1, %c0_i32_0 : i32
    scf.if %2 {
      %cst_10 = arith.constant 0.000000e+00 : f32
      %12 = vector.broadcast %cst_10 : f32 to vector<8x128xf32>
      %c0_11 = arith.constant 0 : index
      %c0_12 = arith.constant 0 : index
      %13 = vector.load %arg8[%c0_11, %c0_12] : memref<8x128xf32, #tpu.memory_space<vmem>>, vector<8x128xf32>
      tpu.vector_store %arg8[%c0_11, %c0_12], %12 {strides = array<i32>} : memref<8x128xf32, #tpu.memory_space<vmem>>, vector<8x128xf32>,
    } else {
    }
    %c0 = arith.constant 0 : index
    %c0_1 = arith.constant 0 : index
    %3 = vector.load %arg8[%c0, %c0_1] : memref<8x128xf32, #tpu.memory_space<vmem>>, vector<8x128xf32>
    %c0_2 = arith.constant 0 : index
    %c0_3 = arith.constant 0 : index
    %4 = vector.load %arg3[%c0_2, %c0_3] : memref<8x128xf32, #tpu.memory_space<vmem>>, vector<8x128xf32>
    %c0_4 = arith.constant 0 : index
    %c0_5 = arith.constant 0 : index
    %5 = vector.load %arg4[%c0_4, %c0_5] : memref<128x128xf32, #tpu.memory_space<vmem>>, vector<128x128xf32>
    %cst = arith.constant dense<0.000000e+00> : vector<8x128xf32>
    %6 = tpu.matmul %4, %5, %cst {dimension_numbers = #tpu.dot_dimension_numbers<[1], [0], [0], [1], [0, 0, 1, 1], [], []>} : vector<8x128xf32>, vector<128x128xf32>, vector<8x128xf32> -> vector<8x128xf32>
    %7 = arith.addf %3, %6 : vector<8x128xf32>
    %c0_6 = arith.constant 0 : index
    %c0_7 = arith.constant 0 : index
    %8 = vector.load %arg8[%c0_6, %c0_7] : memref<8x128xf32, #tpu.memory_space<vmem>>, vector<8x128xf32>
    tpu.vector_store %arg8[%c0_6, %c0_7], %7 {strides = array<i32>} : memref<8x128xf32, #tpu.memory_space<vmem>>, vector<8x128xf32>,
    %c0_i32_8 = arith.constant 0 : i32
    %9 = arith.cmpi eq, %arg2, %c0_i32_8 : i32
    %10 = arith.extui %9 : i1 to i32
    %c0_i32_9 = arith.constant 0 : i32
    %11 = arith.cmpi ne, %10, %c0_i32_9 : i32
    scf.if %11 {
      %c0_10 = arith.constant 0 : index
      %c0_11 = arith.constant 0 : index
      %12 = vector.load %arg8[%c0_10, %c0_11] : memref<8x128xf32, #tpu.memory_space<vmem>>, vector<8x128xf32>
      %c0_12 = arith.constant 0 : index
      %c0_13 = arith.constant 0 : index
      %13 = vector.load %arg5[%c0_12, %c0_13] : memref<1x128xf32, #tpu.memory_space<vmem>>, vector<1x128xf32>
      %14 = vector.broadcast %13 : vector<1x128xf32> to vector<8x128xf32>
      %15 = arith.addf %12, %14 : vector<8x128xf32>
      %cst_14 = arith.constant 0.00999999977 : f32
      %16 = vector.broadcast %cst_14 : f32 to vector<8x128xf32>
      %17 = arith.mulf %16, %15 : vector<8x128xf32>
      %18 = arith.maximumf %15, %17 : vector<8x128xf32>
      %c0_15 = arith.constant 0 : index
      %c0_16 = arith.constant 0 : index
      %19 = vector.load %arg6[%c0_15, %c0_16] : memref<8x128xf32, #tpu.memory_space<vmem>>, vector<8x128xf32>
      %cst_17 = arith.constant 0.899999976 : f32
      %20 = vector.broadcast %cst_17 : f32 to vector<8x128xf32>
      %21 = arith.cmpf olt, %19, %20 : vector<8x128xf32>
      %cst_18 = arith.constant 1.11111116 : f32
      %22 = vector.broadcast %cst_18 : f32 to vector<8x128xf32>
      %23 = arith.mulf %18, %22 : vector<8x128xf32>
      %cst_19 = arith.constant 0.000000e+00 : f32
      %24 = vector.broadcast %cst_19 : f32 to vector<8x128xf32>
      %25 = arith.select %21, %23, %24 : vector<8x128xi1>, vector<8x128xf32>
      %c0_20 = arith.constant 0 : index
      %c0_21 = arith.constant 0 : index
      %26 = vector.load %arg7[%c0_20, %c0_21] : memref<8x128xf32, #tpu.memory_space<vmem>>, vector<8x128xf32>
      tpu.vector_store %arg7[%c0_20, %c0_21], %25 {strides = array<i32>} : memref<8x128xf32, #tpu.memory_space<vmem>>, vector<8x128xf32>,
    } else {
    }
    return
  }
  func.func @transform_0(%arg0: i32, %arg1: i32, %arg2: i32) -> (i32, i32) {
    %c0_i32 = arith.constant 0 : i32
    return %arg0, %arg2 : i32, i32
  }
  func.func @transform_1(%arg0: i32, %arg1: i32, %arg2: i32) -> (i32, i32) {
    %c0_i32 = arith.constant 0 : i32
    return %arg2, %arg1 : i32, i32
  }
  func.func @transform_2(%arg0: i32, %arg1: i32, %arg2: i32) -> (i32, i32) {
    %c0_i32 = arith.constant 0 : i32
    %c0_i32_0 = arith.constant 0 : i32
    return %c0_i32, %arg1 : i32, i32
  }
  func.func @transform_3(%arg0: i32, %arg1: i32, %arg2: i32) -> (i32, i32) {
    %c0_i32 = arith.constant 0 : i32
    return %arg0, %arg1 : i32, i32
  }
  func.func @transform_4(%arg0: i32, %arg1: i32, %arg2: i32) -> (i32, i32) {
    %c0_i32 = arith.constant 0 : i32
    return %arg0, %arg1 : i32, i32
  }
}

</mosaic_0001>

<bundles_post_ra>
// kernel: tpu_custom_call.1
= control target key start
LH: loop header
LB: loop body
LE: loop exit
PB: predicated region body
PF: predicated region fallthrough
CT: control target
= control target key end

     0   :  { %9 = vsyncpa [#allocation4], 0  ;;  %s413_s0 = inlined_call_operand.hbm [shape: f32[8,128], index: 0, kind: input, shape index: {}]   ;;  %s414_s1 = inlined_call_operand.hbm [shape: f32[128,128], index: 1, kind: input, shape index: {}]   ;;  %s415_s2 = inlined_call_operand.vmem [shape: f32[1,128], index: 2, kind: input, shape index: {}]   ;;  %s416_s3 = inlined_call_operand.vmem [shape: f32[8,128], index: 3, kind: input, shape index: {}]   ;;  %s417_s4 = inlined_call_operand.hbm [shape: f32[8,128], index: 4, kind: output, shape index: {}]  }
   0x1   :  { %10 = vsyncpa [#allocation7], 0 }
   0x2   :  { %11 = vsyncpa [#allocation5], 0  ;;  %s331_s15 = smov [#allocation3]   ;;  %s332_s17 = smov [#allocation6]  }
   0x3   :  { %s18_s16 = sshll.u32 %s331_s15, 4  ;;  %s27_s18 = sshll.u32 %s332_s17, 4  ;;  %s19_s16 = int_to_ptr.vmem [resolvable:$true] %s18_s16  ;;  %s364_s18 = int_to_ptr.vmem [resolvable:$true] %s27_s18 }
   0x4   :  { %s259_s21 = scalar_lea.hbm %s413_s0, 128 }
   0x5   :  { %p260_p0 = scmp.ne.s32.totalorder %s413_s0, %s259_s21  ;;  %p263_p1 = scmp.lt.u32.totalorder %s259_s21, %s413_s0 }
   0x7   :  { %p265_p2 = pnand %p263_p1, %p260_p0 }
   0x9   :  { %268 = shalt.err (!%p265_p2)
}
   0xa   :  { %s269_s26 = scalar_lea.vmem %s19_s16, 128  ;;  %p274_p4 = scmp.lt.s32.totalorder %s19_s16, %s19_s16 }
   0xb   :  { %p270_p3 = scmp.ne.s32.totalorder %s19_s16, %s269_s26  ;;  %p275_p5 = scmp.lt.s32.totalorder %s269_s26, %s269_s26 }
   0xd   :  { %p276_p6 = por %p275_p5, %p274_p4 }
   0xf   :  { %p277_p7 = pnand %p276_p6, %p270_p3 }
  0x11   :  { %280 = shalt.err (!%p277_p7)
}
  0x12   :  { %21 = dma.hbm_to_vmem [thread:$0]  %s413_s0, 128, %s19_s16, [#allocation4]  }
  0x13   :  { %s281_s5 = scalar_lea.hbm %s414_s1, 2048 }
  0x14   :  { %p282_p8 = scmp.ne.s32.totalorder %s414_s1, %s281_s5  ;;  %p285_p9 = scmp.lt.u32.totalorder %s281_s5, %s414_s1 }
  0x16   :  { %p287_p10 = pnand %p285_p9, %p282_p8 }
  0x18   :  { %290 = shalt.err (!%p287_p10)
}
  0x19   :  { %s291_s10 = scalar_lea.vmem %s364_s18, 2048  ;;  %p296_p12 = scmp.lt.s32.totalorder %s364_s18, %s364_s18 }
  0x1a   :  { %p292_p11 = scmp.ne.s32.totalorder %s364_s18, %s291_s10  ;;  %p297_p13 = scmp.lt.s32.totalorder %s291_s10, %s291_s10 }
  0x1c   :  { %p298_p0 = por %p297_p13, %p296_p12 }
  0x1e   :  { %p299_p1 = pnand %p298_p0, %p292_p11 }
  0x20   :  { %302 = shalt.err (!%p299_p1)
}
  0x21   :  { %s333_s0 = smov 128   ;;  %s334_s11 = smov 8  }
  0x22   :  { %33 = dma.hbm_to_vmem [thread:$0]  %s414_s1, 2048, %s364_s18, [#allocation7], %s333_s0, %s333_s0, %s334_s11  }
  0x23   :  { %325 = dma.done.wait [#allocation4], 128  }
  0x24   :  { %326 = vsyncadd [#allocation4], 4294967168 }
  0x25   :  { %327 = dma.done.wait [#allocation7], 2048  }
  0x26   :  { %328 = vsyncadd [#allocation7], 4294965248  ;;  %v335_v0 = vmov 0.0|0.0   ;;  %vm336_vm0 = vmmov 0   ;;  %v337_v1 = vmov 0.0   ;;  %v51_v2 = vld [vmem:[#allocation6] sm:$0xff] }
  0x27   :  { %227 = vmatprep.subr.bf16.mxu0 %v335_v0  ;;  %224 = vmatprep.mubr.msk.f32.mxu0 %vm336_vm0, %v337_v1  ;;  %v52_v3 = vld [vmem:[#allocation6 + $0x8] sm:$0xff]  ;;  %v53_v4 = vld [vmem:[#allocation6 + $0x10] sm:$0xff]  ;;  %v54_v6 = vld [vmem:[#allocation6 + $0x18] sm:$0xff]  ;;  %s338_s17 = smov [#allocation8]  }
  0x28   :  { %v228_v5 = vpack.c.bf16 %v52_v3, %v51_v2  ;;  %v231_v7 = vpack.c.bf16 %v54_v6, %v53_v4  ;;  %v55_v8 = vld [vmem:[#allocation6 + $0x20] sm:$0xff]  ;;  %v56_v9 = vld [vmem:[#allocation6 + $0x28] sm:$0xff]  ;;  %v57_v11 = vld [vmem:[#allocation6 + $0x30] sm:$0xff]  ;;  %s164_s18 = sshll.u32 %s338_s17, 4  ;;  %s165_s18 = int_to_ptr.vmem [resolvable:$true] %s164_s18 }
  0x29   :  { %v234_v10 = vpack.c.bf16 %v56_v9, %v55_v8  ;;  %v58_v12 = vld [vmem:[#allocation6 + $0x38] sm:$0xff]  ;;  %v59_v14 = vld [vmem:[#allocation6 + $0x40] sm:$0xff]  ;;  %v60_v15 = vld [vmem:[#allocation6 + $0x48] sm:$0xff]  ;;  %s303_s19 = scalar_lea.vmem %s165_s18, 128  ;;  %p308_p3 = scmp.lt.s32.totalorder %s165_s18, %s165_s18 }
  0x2a   :  { %229 = vmatpush3.bf16.msra.mxu0 %v228_v5  ;;  %v237_v13 = vpack.c.bf16 %v58_v12, %v57_v11  ;;  %v240_v16 = vpack.c.bf16 %v60_v15, %v59_v14  ;;  %v61_v17 = vld [vmem:[#allocation6 + $0x50] sm:$0xff]  ;;  %v62_v18 = vld [vmem:[#allocation6 + $0x58] sm:$0xff]  ;;  %v63_v20 = vld [vmem:[#allocation6 + $0x60] sm:$0xff]  ;;  %p304_p2 = scmp.ne.s32.totalorder %s165_s18, %s303_s19  ;;  %p309_p4 = scmp.lt.s32.totalorder %s303_s19, %s303_s19 }
  0x2b   :  { %230 = vmatprep.subr.bf16.mxu0 %v335_v0  ;;  %v243_v19 = vpack.c.bf16 %v62_v18, %v61_v17  ;;  %v64_v21 = vld [vmem:[#allocation6 + $0x68] sm:$0xff]  ;;  %v65_v23 = vld [vmem:[#allocation6 + $0x70] sm:$0xff]  ;;  %v66_v24 = vld [vmem:[#allocation6 + $0x78] sm:$0xff] }
  0x2c   :  { %v246_v22 = vpack.c.bf16 %v64_v21, %v63_v20  ;;  %v249_v25 = vpack.c.bf16 %v66_v24, %v65_v23  ;;  %v50_v26 = vld [vmem:[#allocation3] sm:$0xff]  ;;  %p310_p5 = por %p309_p4, %p308_p3 }
  0x2d   :  { %v174_v27 = vld [vmem:[%s415_s2] ss:$0 sm:$0xff] }
  0x2e   :  { %232 = vmatpush3.bf16.msra.mxu0 %v231_v7  ;;  %v153_v32 = vld [vmem:[%s416_s3] sm:$0xff]  ;;  %p311_p6 = pnand %p310_p5, %p304_p2 }
  0x2f   :  { %233 = vmatprep.subr.bf16.mxu0 %v335_v0  ;;  %vm154_vm1 = vcmp.lt.f32.partialorder %v153_v32, 0.9 }
  0x32   :  { %235 = vmatpush3.bf16.msra.mxu0 %v234_v10 }
  0x33   :  { %236 = vmatprep.subr.bf16.mxu0 %v335_v0 }
  0x36   :  { %238 = vmatpush3.bf16.msra.mxu0 %v237_v13 }
  0x37   :  { %239 = vmatprep.subr.bf16.mxu0 %v335_v0 }
  0x3a   :  { %241 = vmatpush3.bf16.msra.mxu0 %v240_v16 }
  0x3b   :  { %242 = vmatprep.subr.bf16.mxu0 %v335_v0 }
  0x3e   :  { %244 = vmatpush3.bf16.msra.mxu0 %v243_v19 }
  0x3f   :  { %245 = vmatprep.subr.bf16.mxu0 %v335_v0 }
  0x42   :  { %247 = vmatpush3.bf16.msra.mxu0 %v246_v22 }
  0x43   :  { %248 = vmatprep.subr.bf16.mxu0 %v335_v0 }
  0x46   :  { %250 = vmatpush3.bf16.msra.mxu0 %v249_v25 }
  0x49   :  { %225 = vmatmul.mubr.f32.vlgmr.msra.gmra.mrb[0].mxu0 %v50_v26 }
 0x11c   :  { %v133_v28 = vpop.f32.mrb[0].mxu0 }
 0x11d   :  { %v150_v29 = vadd.f32 %v174_v27, %v133_v28  ;;  %v226_v30 = vpop.f32.mrb[1].mxu0 }
 0x11f   :  { %v151_v31 = vmul.f32 0.01, %v150_v29 }
 0x121   :  { %v152_v33 = vmax.f32 %v150_v29, %v151_v31 }
 0x123   :  { %v155_v34 = vmul.f32 1.1111112, %v152_v33 }
 0x125   :  { %v156_v35 = vsel %vm154_vm1, %v155_v34, 0.0 }
 0x126   :  { %157 = vst [vmem:[#allocation8] sm:$0xff] %v156_v35 }
 0x127   :  { %314 = shalt.err (!%p311_p6)
}
 0x128   :  { %s315_s21 = scalar_lea.hbm %s417_s4, 128 }
 0x129   :  { %p316_p7 = scmp.ne.s32.totalorder %s417_s4, %s315_s21  ;;  %p319_p8 = scmp.lt.u32.totalorder %s315_s21, %s417_s4 }
 0x12b   :  { %p321_p9 = pnand %p319_p8, %p316_p7 }
 0x12d   :  { %324 = shalt.err (!%p321_p9)
}
 0x12e   :  { %167 = dma.vmem_to_hbm [thread:$0]  %s165_s18, 128, %s417_s4, [#allocation5]  }
 0x12f   :  { %329 = dma.done.wait [#allocation5], 128  }
 0x130   :  { %330 = vsyncadd [#allocation5], 4294967168 }
 0x131   :  { %171 = vsyncpa [#allocation4], 1 }
 0x132   :  { %172 = vsyncpa [#allocation7], 1 }
 0x133   :  { %173 = vsyncpa [#allocation5], 1 }

</bundles_post_ra>
